<compile_context>
chip_gen: v7x
topology: tpu7x:2x2x1
jax: 0.10.0
libtpu: 0.0.40
codegen_flags: <defaults>
</compile_context>

<pallas_src>
import functools

import jax
import jax.numpy as jnp
from jax import lax
from jax.experimental import pallas as pl
from jax.experimental.pallas import tpu as pltpu


# ------------------------------- helpers --------------------------------------

def _cdiv(a, b):
    return (a + b - 1) // b


def _round_up(n, m):
    return ((n + m - 1) // m) * m


def _sublane_align(dtype):
    """Sublane packing of the dtype: 8 rows for 4-byte, 16 for 2-byte, 32 for 1-byte."""
    return {4: 8, 2: 16, 1: 32}.get(jnp.dtype(dtype).itemsize, 8)


def _vmem_budget_bytes():
    """Generation-aware usable-VMEM target (~40 MiB on v7x, ~96 MiB on v5e/v6e)."""
    cap = 64 * 1024 * 1024                       # conservative fallback (v7x physical)
    try:
        info = pltpu.get_tpu_info()
        cap = int(getattr(info, "vmem_capacity_bytes", cap)) or cap
    except Exception:
        pass
    return max(min(cap * 3 // 4, cap - 24 * 1024 * 1024), 16 * 1024 * 1024)


def _choose_row_tile(rows, per_row_bytes, *, align, budget, max_tile=1024, prefer_tiles=2):
    """Row tile that minimizes trailing padding, fits the VMEM budget, is sublane-aligned,
    and (when possible) yields >= 2 grid steps so the parallel axis can megacore-shard."""
    rows_a = _round_up(max(rows, 1), align)
    cap = max(budget // max(per_row_bytes, 1), align)
    cap = max((cap // align) * align, align)
    max_tile = max(min(max_tile, cap), align)
    n_tiles = _cdiv(rows_a, max_tile)
    if rows_a > align:
        n_tiles = max(n_tiles, prefer_tiles)
    return _round_up(_cdiv(rows_a, n_tiles), align)


def _const_spec(shape, index_map):
    """BlockSpec for grid-invariant operands: single-buffered (no wasted double buffer)."""
    try:
        return pl.BlockSpec(shape, index_map, pipeline_mode=pl.Buffered(1))
    except TypeError:   # older jax without pipeline_mode kwarg
        return pl.BlockSpec(shape, index_map)


# ----------------------------- LayerNorm kernel -------------------------------
# Standalone LN (used by the generic PreNorm path when `fn` is an arbitrary module).

def _layernorm_kernel(x_ref, g_ref, b_ref, o_ref, *, eps):
    x = x_ref[...].astype(jnp.float32)
    mu = jnp.mean(x, axis=-1, keepdims=True)
    var = jnp.mean((x - mu) ** 2, axis=-1, keepdims=True)      # two-pass: robust
    y = (x - mu) * lax.rsqrt(var + eps) * g_ref[...] + b_ref[...]
    o_ref[...] = y.astype(o_ref.dtype)


def layernorm_pallas(x, gamma, beta, eps=1e-5):
    """LayerNorm over the last dim of x (any leading dims)."""
    orig_shape = x.shape
    D = orig_shape[-1]
    x2 = x.reshape(-1, D)
    R = x2.shape[0]

    x_item = jnp.dtype(x.dtype).itemsize
    align = _sublane_align(x.dtype)
    budget = _vmem_budget_bytes()
    resident = 2 * D * 4                               # gamma + beta, single-buffered
    per_row = 2 * 2 * D * x_item + 2 * D * 4           # in/out double-buffered + f32 temps
    tile_r = _choose_row_tile(R, per_row, align=align,
                              budget=max(budget - resident, budget // 8))
    R_pad = _round_up(R, tile_r)
    if R_pad != R:
        x2 = jnp.pad(x2, ((0, R_pad - R), (0, 0)))

    g2 = gamma.reshape(1, D).astype(jnp.float32)
    b2 = beta.reshape(1, D).astype(jnp.float32)

    out = pl.pallas_call(
        functools.partial(_layernorm_kernel, eps=eps),
        out_shape=jax.ShapeDtypeStruct((R_pad, D), x.dtype),
        grid_spec=pltpu.PrefetchScalarGridSpec(
            num_scalar_prefetch=0,
            grid=(R_pad // tile_r,),
            in_specs=[
                pl.BlockSpec((tile_r, D), lambda i: (i, 0)),     # rows (streamed)
                _const_spec((1, D), lambda i: (0, 0)),           # gamma (resident, 1-buf)
                _const_spec((1, D), lambda i: (0, 0)),           # beta  (resident, 1-buf)
            ],
            out_specs=pl.BlockSpec((tile_r, D), lambda i: (i, 0)),
        ),
        compiler_params=pltpu.CompilerParams(
            dimension_semantics=("parallel",),
            vmem_limit_bytes=budget,
        ),
        cost_estimate=pl.CostEstimate(
            flops=10 * R_pad * D,
            transcendentals=R_pad,
            bytes_accessed=2 * R_pad * D * x_item + 2 * D * 4,
        ),
    )(x2, g2, b2)
    if R_pad != R:
        out = out[:R]
    return out.reshape(orig_shape)


# ------------------- fused LN(x) + LN(ctx) + linear fn kernel ------------------
# The PyTorch module wraps an arbitrary `fn`; here the concrete fn is
#   fn(x, context) = x @ W + context @ Wc + b
# and the whole PreNorm forward runs as ONE pallas_call.  LN affine is folded into
# [W;Wc]/bias on the host, so the kernel only normalizes and does one MXU dot.

def _fused_prenorm_kernel(x_ref, c_ref, w_ref, bias_ref, o_ref, xc_ref, *, eps):
    # Normalize once per row tile (column tile 0) and cache in bf16 scratch.
    @pl.when(pl.program_id(1) == 0)
    def _():
        def _ln(v_ref):
            v = v_ref[...].astype(jnp.float32)
            mu = jnp.mean(v, axis=-1, keepdims=True)
            var = jnp.mean((v - mu) ** 2, axis=-1, keepdims=True)   # two-pass
            return (v - mu) * lax.rsqrt(var + eps)

        xc_ref[...] = jnp.concatenate([_ln(x_ref), _ln(c_ref)], axis=-1).astype(xc_ref.dtype)

    acc = jnp.dot(xc_ref[...], w_ref[...], preferred_element_type=jnp.float32)
    o_ref[...] = (acc + bias_ref[...].astype(jnp.float32)).astype(o_ref.dtype)


def fused_prenorm_linear(x, context, gx, bx, gc, bc, W, Wc, bias, eps=1e-5,
                         dot_dtype=jnp.bfloat16):
    """out = LayerNorm(x) @ W + LayerNorm(context) @ Wc + bias, in a single kernel."""
    D, Dout = W.shape
    Dc = Wc.shape[0]
    lead = x.shape[:-1]
    x2 = x.reshape(-1, D)
    c2 = context.reshape(-1, Dc)
    R = x2.shape[0]
    assert c2.shape[0] == R, "x and context rows must align for the fused linear fn"

    f32 = jnp.float32
    # Fold LN affine into the linear fn (host side, one time):
    #   W' = diag(gx) @ W,  Wc' = diag(gc) @ Wc,  bias' = bias + bx @ W + bc @ Wc
    W32, Wc32 = W.astype(f32), Wc.astype(f32)
    W_f = gx.astype(f32)[:, None] * W32
    Wc_f = gc.astype(f32)[:, None] * Wc32
    bias_f = bias.astype(f32) + bx.astype(f32) @ W32 + bc.astype(f32) @ Wc32

    x_item = jnp.dtype(x.dtype).itemsize
    w_item = jnp.dtype(dot_dtype).itemsize
    din = D + Dc
    budget = _vmem_budget_bytes()

    # ---- Dout column tiling: keep [W;Wc] fully resident when it fits, else stream
    #      256-aligned column tiles (MXU-width friendly on v6e/v7x).
    full_w_bytes = din * Dout * w_item
    if full_w_bytes <= budget // 3:
        tile_n, w_bufs = Dout, 1
    else:
        per_col = 2 * din * w_item
        tn = max((budget // 3) // per_col, 128)
        tn = (tn // 256) * 256 if tn >= 256 else 128
        tile_n, w_bufs = min(tn, _round_up(Dout, 128)), 2
    Dout_pad = _round_up(Dout, tile_n)

    # ---- row tiling: budget = total - resident(weights/bias), per-row includes streamed
    #      x/c/out (double-buffered), the bf16 scratch and the f32 temporaries.
    align = max(_sublane_align(x.dtype), _sublane_align(dot_dtype))
    resident = w_bufs * din * tile_n * w_item + 2 * tile_n * 4
    per_row = (2 * (din + tile_n) * x_item      # streamed x/c/out tiles (2-buffered)
               + din * w_item                   # normalized-rows scratch
               + 3 * din * 4 + 2 * tile_n * 4)  # f32 temporaries inside the kernel
    tile_r = _choose_row_tile(R, per_row, align=align,
                              budget=max(budget - resident, budget // 8))
    R_pad = _round_up(R, tile_r)
    if R_pad != R:
        x2 = jnp.pad(x2, ((0, R_pad - R), (0, 0)))
        c2 = jnp.pad(c2, ((0, R_pad - R), (0, 0)))

    W_stack = jnp.concatenate([W_f, Wc_f], axis=0)           # (D+Dc, Dout)
    if Dout_pad != Dout:
        W_stack = jnp.pad(W_stack, ((0, 0), (0, Dout_pad - Dout)))
        bias_f = jnp.pad(bias_f, ((0, Dout_pad - Dout),))
    W_stack = W_stack.astype(dot_dtype)                       # bf16 MXU operand
    bias2 = bias_f.reshape(1, Dout_pad)

    grid = (R_pad // tile_r, Dout_pad // tile_n)

    if w_bufs == 1:
        w_spec = _const_spec((din, tile_n), lambda i, j: (0, j))     # resident, 1-buf
    else:
        w_spec = pl.BlockSpec((din, tile_n), lambda i, j: (0, j))    # streamed cols
    if grid[1] == 1:
        b_spec = _const_spec((1, tile_n), lambda i, j: (0, j))
    else:
        b_spec = pl.BlockSpec((1, tile_n), lambda i, j: (0, j))

    cost = pl.CostEstimate(
        flops=2 * R_pad * din * Dout_pad + 12 * R_pad * din,
        transcendentals=2 * R_pad,
        bytes_accessed=R_pad * (din + Dout_pad) * x_item + din * Dout_pad * w_item,
    )

    out = pl.pallas_call(
        functools.partial(_fused_prenorm_kernel, eps=eps),
        out_shape=jax.ShapeDtypeStruct((R_pad, Dout_pad), x.dtype),
        grid_spec=pltpu.PrefetchScalarGridSpec(
            num_scalar_prefetch=0,
            grid=grid,
            in_specs=[
                pl.BlockSpec((tile_r, D), lambda i, j: (i, 0)),    # x rows (streamed)
                pl.BlockSpec((tile_r, Dc), lambda i, j: (i, 0)),   # context rows (streamed)
                w_spec,                                            # [W;Wc] (LN-folded)
                b_spec,                                            # bias (LN-folded)
            ],
            out_specs=pl.BlockSpec((tile_r, tile_n), lambda i, j: (i, j)),
            scratch_shapes=[pltpu.VMEM((tile_r, din), dot_dtype)],  # normalized rows cache
        ),
        compiler_params=pltpu.CompilerParams(
            # rows are independent (megacore-shardable); column axis reuses the LN scratch
            # computed at j == 0 so it must stay "arbitrary".
            dimension_semantics=("parallel", "arbitrary"),
            vmem_limit_bytes=budget,
        ),
        cost_estimate=cost,
    )(x2, c2, W_stack, bias2)

    if R_pad != R or Dout_pad != Dout:
        out = out[:R, :Dout]
    return out.reshape(lead + (Dout,))


# --------------------------------- PreNorm -------------------------------------

class LinearXContextFn:
    """Concrete wrapped module: fn(x, context) = x @ W + context @ Wc + b."""

    def __init__(self, W, Wc, b):
        self.W, self.Wc, self.b = W, Wc, b

    def __call__(self, x, context):   # generic (non-fused) fallback, plain JAX
        return jnp.einsum("...d,de->...e", x, self.W) + \
               jnp.einsum("...c,ce->...e", context, self.Wc) + self.b


class PreNormPallas:
    """Mirror of the PyTorch PreNorm: LayerNorm(x) [+ LayerNorm(context)] -> fn."""

    def __init__(self, dim, fn, context_dim=None, eps=1e-5):
        self.fn = fn
        self.dim = dim
        self.context_dim = context_dim
        self.eps = eps
        # torch.nn.LayerNorm defaults: weight=1, bias=0, eps=1e-5
        self.norm_w = jnp.ones((dim,), jnp.float32)
        self.norm_b = jnp.zeros((dim,), jnp.float32)
        if context_dim is not None:
            self.norm_ctx_w = jnp.ones((context_dim,), jnp.float32)
            self.norm_ctx_b = jnp.zeros((context_dim,), jnp.float32)
        else:
            self.norm_ctx_w = None
            self.norm_ctx_b = None

    def __call__(self, x, **kwargs):
        # Fused fast path: LN(x) + LN(context) + linear fn in ONE pallas_call.
        if (isinstance(self.fn, LinearXContextFn) and self.norm_ctx_w is not None
                and "context" in kwargs):
            return fused_prenorm_linear(
                x, kwargs["context"],
                self.norm_w, self.norm_b, self.norm_ctx_w, self.norm_ctx_b,
                self.fn.W, self.fn.Wc, self.fn.b, eps=self.eps)

        # Generic path: Pallas LayerNorm(s), then an arbitrary fn.
        # TODO(synk): arbitrary wrapped `fn` modules are not lowered to Pallas here.
        x = layernorm_pallas(x, self.norm_w, self.norm_b, eps=self.eps)
        if self.norm_ctx_w is not None:
            context = kwargs["context"]
            kwargs.update(context=layernorm_pallas(
                context, self.norm_ctx_w, self.norm_ctx_b, eps=self.eps))
        return self.fn(x, **kwargs)


# -------------------------------- reference ------------------------------------

def _layernorm_ref(v, g, b, eps=1e-5):
    v32 = v.astype(jnp.float32)
    mu = jnp.mean(v32, axis=-1, keepdims=True)
    var = jnp.mean((v32 - mu) ** 2, axis=-1, keepdims=True)
    return (v32 - mu) * lax.rsqrt(var + eps) * g + b


if __name__ == "__main__":
    key = jax.random.PRNGKey(0)
    kx, kc, kw, kwc, kb = jax.random.split(key, 5)

    B, S = 2, 8
    D, Dc, Dout = 128, 128, 128     # lane-dense feature dims (multiples of 128)

    x = jax.random.normal(kx, (B, S, D), jnp.float32)
    context = jax.random.normal(kc, (B, S, Dc), jnp.float32)

    W = jax.random.normal(kw, (D, Dout), jnp.float32) * 0.05
    Wc = jax.random.normal(kwc, (Dc, Dout), jnp.float32) * 0.05
    b = jax.random.normal(kb, (Dout,), jnp.float32) * 0.05

    prenorm = PreNormPallas(D, LinearXContextFn(W, Wc, b), context_dim=Dc)
    out = jax.block_until_ready(prenorm(x, context=context))

    # reference (pure JAX, f32); kernel dots use bf16 MXU inputs -> looser tolerance
    xn_ref = _layernorm_ref(x, prenorm.norm_w, prenorm.norm_b)
    cn_ref = _layernorm_ref(context, prenorm.norm_ctx_w, prenorm.norm_ctx_b)
    ref = (jnp.einsum("bsd,de->bse", xn_ref, W, precision=lax.Precision.HIGHEST)
           + jnp.einsum("bsc,ce->bse", cn_ref, Wc, precision=lax.Precision.HIGHEST) + b)

    assert out.shape == (B, S, Dout)
    assert jnp.allclose(out, ref, atol=2e-2, rtol=2e-2), "fused PreNorm mismatch vs reference"

    # also exercise the generic path (no context norm): standalone Pallas LayerNorm (f32)
    prenorm_nc = PreNormPallas(D, lambda x: x)
    ln_out = jax.block_until_ready(prenorm_nc(x))
    ln_ref = _layernorm_ref(x, prenorm_nc.norm_w, prenorm_nc.norm_b)
    assert jnp.allclose(ln_out, ln_ref, atol=1e-4, rtol=1e-4), "standalone LayerNorm mismatch"

    print("KERNEL_OK")
</pallas_src>

<mosaic_0001>
module attributes {stable_mosaic.version = 11 : i64} {
  func.func @_fused_prenorm_kernel(%arg0: i32, %arg1: i32, %arg2: memref<16x128xf32, #tpu.memory_space<vmem>>, %arg3: memref<16x128xf32, #tpu.memory_space<vmem>>, %arg4: memref<256x128xbf16, #tpu.memory_space<vmem>>, %arg5: memref<1x128xf32, #tpu.memory_space<vmem>>, %arg6: memref<16x128xf32, #tpu.memory_space<vmem>>, %arg7: memref<16x256xbf16, #tpu.memory_space<vmem>>) attributes {dimension_semantics = [#tpu.dimension_semantics<parallel>, #tpu.dimension_semantics<arbitrary>], iteration_bounds = array<i64: 1, 1>, scalar_prefetch = 0 : i64, scratch_operands = 1 : i64, tpu.core_type = #tpu.core_type<tc>, window_params = [{transform_indices = @transform_0, window_bounds = array<i64: 16, 128>}, {transform_indices = @transform_1, window_bounds = array<i64: 16, 128>}, {pipeline_mode = #tpu.pipeline_mode<synchronous>, transform_indices = @transform_2, window_bounds = array<i64: 256, 128>}, {pipeline_mode = #tpu.pipeline_mode<synchronous>, transform_indices = @transform_3, window_bounds = array<i64: 1, 128>}, {transform_indices = @transform_4, window_bounds = array<i64: 16, 128>}]} {
    %c0_i32 = arith.constant 0 : i32
    %0 = arith.cmpi eq, %arg1, %c0_i32 : i32
    %1 = arith.extui %0 : i1 to i32
    %c0_i32_0 = arith.constant 0 : i32
    %2 = arith.cmpi ne, %1, %c0_i32_0 : i32
    scf.if %2 {
      %c0_8 = arith.constant 0 : index
      %c0_9 = arith.constant 0 : index
      %10 = vector.load %arg2[%c0_8, %c0_9] : memref<16x128xf32, #tpu.memory_space<vmem>>, vector<16x128xf32>
      %cst_10 = arith.constant dense<0.000000e+00> : vector<16xf32>
      %11 = vector.multi_reduction <add>, %10, %cst_10 [1] : vector<16x128xf32> to vector<16xf32>
      %12 = vector.shape_cast %11 : vector<16xf32> to vector<16x1xf32>
      %cst_11 = arith.constant 1.280000e+02 : f32
      %13 = vector.broadcast %cst_11 : f32 to vector<16x1xf32>
      %14 = arith.divf %12, %13 : vector<16x1xf32>
      %15 = vector.broadcast %14 : vector<16x1xf32> to vector<16x128xf32>
      %16 = arith.subf %10, %15 : vector<16x128xf32>
      %17 = arith.mulf %16, %16 : vector<16x128xf32>
      %cst_12 = arith.constant dense<0.000000e+00> : vector<16xf32>
      %18 = vector.multi_reduction <add>, %17, %cst_12 [1] : vector<16x128xf32> to vector<16xf32>
      %19 = vector.shape_cast %18 : vector<16xf32> to vector<16x1xf32>
      %cst_13 = arith.constant 1.280000e+02 : f32
      %20 = vector.broadcast %cst_13 : f32 to vector<16x1xf32>
      %21 = arith.divf %19, %20 : vector<16x1xf32>
      %22 = vector.broadcast %14 : vector<16x1xf32> to vector<16x128xf32>
      %23 = arith.subf %10, %22 : vector<16x128xf32>
      %cst_14 = arith.constant 9.99999974E-6 : f32
      %24 = vector.broadcast %cst_14 : f32 to vector<16x1xf32>
      %25 = arith.addf %21, %24 : vector<16x1xf32>
      %26 = math.rsqrt %25 : vector<16x1xf32>
      %27 = vector.broadcast %26 : vector<16x1xf32> to vector<16x128xf32>
      %28 = arith.mulf %23, %27 : vector<16x128xf32>
      %c0_15 = arith.constant 0 : index
      %c0_16 = arith.constant 0 : index
      %29 = vector.load %arg3[%c0_15, %c0_16] : memref<16x128xf32, #tpu.memory_space<vmem>>, vector<16x128xf32>
      %cst_17 = arith.constant dense<0.000000e+00> : vector<16xf32>
      %30 = vector.multi_reduction <add>, %29, %cst_17 [1] : vector<16x128xf32> to vector<16xf32>
      %31 = vector.shape_cast %30 : vector<16xf32> to vector<16x1xf32>
      %cst_18 = arith.constant 1.280000e+02 : f32
      %32 = vector.broadcast %cst_18 : f32 to vector<16x1xf32>
      %33 = arith.divf %31, %32 : vector<16x1xf32>
      %34 = vector.broadcast %33 : vector<16x1xf32> to vector<16x128xf32>
      %35 = arith.subf %29, %34 : vector<16x128xf32>
      %36 = arith.mulf %35, %35 : vector<16x128xf32>
      %cst_19 = arith.constant dense<0.000000e+00> : vector<16xf32>
      %37 = vector.multi_reduction <add>, %36, %cst_19 [1] : vector<16x128xf32> to vector<16xf32>
      %38 = vector.shape_cast %37 : vector<16xf32> to vector<16x1xf32>
      %cst_20 = arith.constant 1.280000e+02 : f32
      %39 = vector.broadcast %cst_20 : f32 to vector<16x1xf32>
      %40 = arith.divf %38, %39 : vector<16x1xf32>
      %41 = vector.broadcast %33 : vector<16x1xf32> to vector<16x128xf32>
      %42 = arith.subf %29, %41 : vector<16x128xf32>
      %cst_21 = arith.constant 9.99999974E-6 : f32
      %43 = vector.broadcast %cst_21 : f32 to vector<16x1xf32>
      %44 = arith.addf %40, %43 : vector<16x1xf32>
      %45 = math.rsqrt %44 : vector<16x1xf32>
      %46 = vector.broadcast %45 : vector<16x1xf32> to vector<16x128xf32>
      %47 = arith.mulf %42, %46 : vector<16x128xf32>
      %48 = tpu.concatenate %28, %47 in 1 : vector<16x128xf32>, vector<16x128xf32> -> vector<16x256xf32>
      %49 = arith.truncf %48 : vector<16x256xf32> to vector<16x256xbf16>
      %c0_22 = arith.constant 0 : index
      %c0_23 = arith.constant 0 : index
      %50 = vector.load %arg7[%c0_22, %c0_23] : memref<16x256xbf16, #tpu.memory_space<vmem>>, vector<16x256xbf16>
      tpu.vector_store %arg7[%c0_22, %c0_23], %49 {strides = array<i32>} : memref<16x256xbf16, #tpu.memory_space<vmem>>, vector<16x256xbf16>,
    } else {
    }
    %c0 = arith.constant 0 : index
    %c0_1 = arith.constant 0 : index
    %3 = vector.load %arg7[%c0, %c0_1] : memref<16x256xbf16, #tpu.memory_space<vmem>>, vector<16x256xbf16>
    %c0_2 = arith.constant 0 : index
    %c0_3 = arith.constant 0 : index
    %4 = vector.load %arg4[%c0_2, %c0_3] : memref<256x128xbf16, #tpu.memory_space<vmem>>, vector<256x128xbf16>
    %cst = arith.constant dense<0.000000e+00> : vector<16x128xf32>
    %5 = tpu.matmul %3, %4, %cst {dimension_numbers = #tpu.dot_dimension_numbers<[1], [0], [0], [1], [0, 0, 1, 1], [], []>} : vector<16x256xbf16>, vector<256x128xbf16>, vector<16x128xf32> -> vector<16x128xf32>
    %c0_4 = arith.constant 0 : index
    %c0_5 = arith.constant 0 : index
    %6 = vector.load %arg5[%c0_4, %c0_5] : memref<1x128xf32, #tpu.memory_space<vmem>>, vector<1x128xf32>
    %7 = vector.broadcast %6 : vector<1x128xf32> to vector<16x128xf32>
    %8 = arith.addf %5, %7 : vector<16x128xf32>
    %c0_6 = arith.constant 0 : index
    %c0_7 = arith.constant 0 : index
    %9 = vector.load %arg6[%c0_6, %c0_7] : memref<16x128xf32, #tpu.memory_space<vmem>>, vector<16x128xf32>
    tpu.vector_store %arg6[%c0_6, %c0_7], %8 {strides = array<i32>} : memref<16x128xf32, #tpu.memory_space<vmem>>, vector<16x128xf32>,
    return
  }
  func.func @transform_0(%arg0: i32, %arg1: i32) -> (i32, i32) {
    %c0_i32 = arith.constant 0 : i32
    %c0_i32_0 = arith.constant 0 : i32
    return %arg0, %c0_i32 : i32, i32
  }
  func.func @transform_1(%arg0: i32, %arg1: i32) -> (i32, i32) {
    %c0_i32 = arith.constant 0 : i32
    %c0_i32_0 = arith.constant 0 : i32
    return %arg0, %c0_i32 : i32, i32
  }
  func.func @transform_2(%arg0: i32, %arg1: i32) -> (i32, i32) {
    %c0_i32 = arith.constant 0 : i32
    %c0_i32_0 = arith.constant 0 : i32
    return %c0_i32, %arg1 : i32, i32
  }
  func.func @transform_3(%arg0: i32, %arg1: i32) -> (i32, i32) {
    %c0_i32 = arith.constant 0 : i32
    %c0_i32_0 = arith.constant 0 : i32
    return %c0_i32, %arg1 : i32, i32
  }
  func.func @transform_4(%arg0: i32, %arg1: i32) -> (i32, i32) {
    %c0_i32 = arith.constant 0 : i32
    return %arg0, %arg1 : i32, i32
  }
}

</mosaic_0001>

<bundles_post_ra>
// kernel: tpu_custom_call.1
= control target key start
LH: loop header
LB: loop body
LE: loop exit
PB: predicated region body
PF: predicated region fallthrough
CT: control target
= control target key end

     0   :  { %9 = vsyncpa [#allocation4], 0  ;;  %s585_s0 = inlined_call_operand.hbm [shape: f32[16,128], index: 0, kind: input, shape index: {}]   ;;  %s586_s1 = inlined_call_operand.hbm [shape: f32[16,128], index: 1, kind: input, shape index: {}]   ;;  %s587_s2 = inlined_call_operand.hbm [shape: bf16[256,128], index: 2, kind: input, shape index: {}]   ;;  %s588_s3 = inlined_call_operand.vmem [shape: f32[1,128], index: 3, kind: input, shape index: {}]   ;;  %s589_s4 = inlined_call_operand.hbm [shape: f32[16,128], index: 4, kind: output, shape index: {}]  }
   0x1   :  { %10 = vsyncpa [#allocation7], 0 }
   0x2   :  { %11 = vsyncpa [#allocation5], 0  ;;  %s480_s15 = smov [#allocation6]   ;;  %s481_s17 = smov [#allocation3]  }
   0x3   :  { %s29_s16 = sshll.u32 %s480_s15, 4  ;;  %s17_s18 = sshll.u32 %s481_s17, 4  ;;  %s30_s16 = int_to_ptr.vmem [resolvable:$true] %s29_s16  ;;  %s513_s18 = int_to_ptr.vmem [resolvable:$true] %s17_s18 }
   0x4   :  { %s386_s21 = scalar_lea.hbm %s586_s1, 256 }
   0x5   :  { %p387_p0 = scmp.ne.s32.totalorder %s586_s1, %s386_s21  ;;  %p390_p1 = scmp.lt.u32.totalorder %s386_s21, %s586_s1 }
   0x7   :  { %p392_p2 = pnand %p390_p1, %p387_p0 }
   0x9   :  { %395 = shalt.err (!%p392_p2)
}
   0xa   :  { %s396_s26 = scalar_lea.vmem %s30_s16, 256  ;;  %p401_p4 = scmp.lt.s32.totalorder %s30_s16, %s30_s16 }
   0xb   :  { %p397_p3 = scmp.ne.s32.totalorder %s30_s16, %s396_s26  ;;  %p402_p5 = scmp.lt.s32.totalorder %s396_s26, %s396_s26 }
   0xd   :  { %p403_p6 = por %p402_p5, %p401_p4 }
   0xf   :  { %p404_p7 = pnand %p403_p6, %p397_p3 }
  0x11   :  { %407 = shalt.err (!%p404_p7)
}
  0x12   :  { %s482_s27 = smov 128   ;;  %s483_s28 = smov 8  }
  0x13   :  { %35 = dma.hbm_to_vmem [thread:$0]  %s586_s1, 256, %s30_s16, [#allocation7], %s482_s27, %s482_s27, %s483_s28  }
  0x14   :  { %s408_s7 = scalar_lea.hbm %s585_s0, 256 }
  0x15   :  { %p409_p8 = scmp.ne.s32.totalorder %s585_s0, %s408_s7  ;;  %p412_p9 = scmp.lt.u32.totalorder %s408_s7, %s585_s0 }
  0x17   :  { %p414_p10 = pnand %p412_p9, %p409_p8 }
  0x19   :  { %417 = shalt.err (!%p414_p10)
}
  0x1a   :  { %s418_s12 = scalar_lea.vmem %s513_s18, 256  ;;  %p423_p12 = scmp.lt.s32.totalorder %s513_s18, %s513_s18 }
  0x1b   :  { %p419_p11 = scmp.ne.s32.totalorder %s513_s18, %s418_s12  ;;  %p424_p13 = scmp.lt.s32.totalorder %s418_s12, %s418_s12 }
  0x1d   :  { %p425_p0 = por %p424_p13, %p423_p12 }
  0x1f   :  { %p426_p1 = pnand %p425_p0, %p419_p11 }
  0x21   :  { %429 = shalt.err (!%p426_p1)
}
  0x22   :  { %23 = dma.hbm_to_vmem [thread:$0]  %s585_s0, 256, %s513_s18, [#allocation4], %s482_s27, %s482_s27, %s483_s28  }
  0x23   :  { %s484_s14 = smov [#allocation8]   ;;  %s430_s19 = scalar_lea.hbm %s587_s2, 2048 }
  0x24   :  { %s41_s15 = sshll.u32 %s484_s14, 4  ;;  %p431_p2 = scmp.ne.s32.totalorder %s587_s2, %s430_s19  ;;  %s42_s15 = int_to_ptr.vmem [resolvable:$true] %s41_s15 }
  0x25   :  { %p434_p3 = scmp.lt.u32.totalorder %s430_s19, %s587_s2 }
  0x27   :  { %p436_p4 = pnand %p434_p3, %p431_p2 }
  0x29   :  { %439 = shalt.err (!%p436_p4)
}
  0x2a   :  { %s440_s24 = scalar_lea.vmem %s42_s15, 2048  ;;  %p445_p6 = scmp.lt.s32.totalorder %s42_s15, %s42_s15 }
  0x2b   :  { %p441_p5 = scmp.ne.s32.totalorder %s42_s15, %s440_s24  ;;  %p446_p7 = scmp.lt.s32.totalorder %s440_s24, %s440_s24 }
  0x2d   :  { %p447_p8 = por %p446_p7, %p445_p6 }
  0x2f   :  { %p448_p9 = pnand %p447_p8, %p441_p5 }
  0x31   :  { %451 = shalt.err (!%p448_p9)
}
  0x32   :  { %s485_s0 = smov 64   ;;  %s486_s18 = smov 4  }
  0x33   :  { %47 = dma.hbm_to_vmem [thread:$0]  %s587_s2, 2048, %s42_s15, [#allocation7], %s485_s0, %s485_s0, %s486_s18  }
  0x34   :  { %474 = dma.done.wait [#allocation4], 256  }
  0x35   :  { %475 = vsyncadd [#allocation4], 4294967040 }
  0x36   :  { %476 = dma.done.wait [#allocation7], 2304  }
  0x37   :  { %477 = vsyncadd [#allocation7], 4294964992  ;;  %v89_v0 = vld [vmem:[#allocation6] sm:$0xff]  ;;  %v90_v1 = vld [vmem:[#allocation6 + $0x8] sm:$0xff]  ;;  %s487_s30 = smov [#allocation9]  }
  0x38   :  { %v64_v2 = vld [vmem:[#allocation3] sm:$0xff]  ;;  %91 = vadd.xlane.f32.xlu0 %v89_v0  ;;  %v65_v3 = vld [vmem:[#allocation3 + $0x8] sm:$0xff]  ;;  %v366_v24 = vld [vmem:[#allocation8 + $0x50] sm:$0xff]   ;;  %s302_s5 = sshll.u32 %s487_s30, 4  ;;  %s303_s5 = int_to_ptr.vmem [resolvable:$true] %s302_s5 }
  0x39   :  { %66 = vadd.xlane.f32.xlu1 %v64_v2  ;;  %v362_v4 = vld [vmem:[#allocation8 + $0x40] sm:$0xff]   ;;  %v364_v6 = vld [vmem:[#allocation8 + $0x48] sm:$0xff]   ;;  %v367_v25 = vld [vmem:[#allocation8 + $0x10] sm:$0xff]   ;;  %s452_s6 = scalar_lea.vmem %s303_s5, 256  ;;  %p457_p11 = scmp.lt.s32.totalorder %s303_s5, %s303_s5 }
  0x3a   :  { %v363_v5 = vld [vmem:[#allocation8] sm:$0xff]   ;;  %332 = vmatprep.subr.bf16.mxu0 %v362_v4  ;;  %v365_v23 = vld [vmem:[#allocation8 + $0x8] sm:$0xff]   ;;  %v368_v26 = vld [vmem:[#allocation8 + $0x58] sm:$0xff]   ;;  %p453_p10 = scmp.ne.s32.totalorder %s303_s5, %s452_s6  ;;  %p458_p12 = scmp.lt.s32.totalorder %s452_s6, %s452_s6 }
  0x3b   :  { %333 = vmatpush3.bf16.msra.mxu0 %v363_v5  ;;  %v369_v27 = vld [vmem:[#allocation8 + $0x18] sm:$0xff]   ;;  %v370_v28 = vld [vmem:[#allocation8 + $0x60] sm:$0xff]   ;;  %v372_v30 = vld [vmem:[#allocation8 + $0x68] sm:$0xff]  }
  0x3c   :  { %93 = vadd.xlane.f32.xlu0 %v90_v1  ;;  %334 = vmatprep.subr.bf16.mxu0 %v364_v6  ;;  %v371_v29 = vld [vmem:[#allocation8 + $0x20] sm:$0xff]   ;;  %v373_v31 = vld [vmem:[#allocation8 + $0x28] sm:$0xff]   ;;  %v374_v32 = vld [vmem:[#allocation8 + $0x70] sm:$0xff]   ;;  %p459_p13 = por %p458_p12, %p457_p11 }
  0x3d   :  { %68 = vadd.xlane.f32.xlu1 %v65_v3  ;;  %v375_v33 = vld [vmem:[#allocation8 + $0x30] sm:$0xff]   ;;  %v376_v34 = vld [vmem:[#allocation8 + $0x78] sm:$0xff]   ;;  %v315_v59 = vld [vmem:[%s588_s3] ss:$0 sm:$0xff] }
  0x3e   :  { %v377_v35 = vld [vmem:[#allocation8 + $0x38] sm:$0xff]   ;;  %p460_p0 = pnand %p459_p13, %p453_p10 }
  0x3f   :  { %335 = vmatpush3.bf16.msra.mxu0 %v365_v23 }
  0x40   :  { %336 = vmatprep.subr.bf16.mxu0 %v366_v24 }
  0x43   :  { %337 = vmatpush3.bf16.msra.mxu0 %v367_v25 }
  0x44   :  { %338 = vmatprep.subr.bf16.mxu0 %v368_v26 }
  0x47   :  { %339 = vmatpush3.bf16.msra.mxu0 %v369_v27 }
  0x48   :  { %340 = vmatprep.subr.bf16.mxu0 %v370_v28 }
  0x4b   :  { %341 = vmatpush3.bf16.msra.mxu0 %v371_v29 }
  0x4c   :  { %342 = vmatprep.subr.bf16.mxu0 %v372_v30 }
  0x4f   :  { %343 = vmatpush3.bf16.msra.mxu0 %v373_v31 }
  0x50   :  { %344 = vmatprep.subr.bf16.mxu0 %v374_v32 }
  0x53   :  { %345 = vmatpush3.bf16.msra.mxu0 %v375_v33 }
  0x54   :  { %346 = vmatprep.subr.bf16.mxu0 %v376_v34 }
  0x57   :  { %347 = vmatpush3.bf16.msra.mxu0 %v377_v35 }
  0xc5   :  { %v92_v7 = vpop.xlane.xlu0 %91 }
  0xc6   :  { %v67_v8 = vpop.xlane.xlu1 %66  ;;  %v95_v9 = vmul.f32 0.0078125, %v92_v7 }
  0xc7   :  { %v71_v10 = vmul.f32 0.0078125, %v67_v8 }
  0xc8   :  { %v97_v11 = vsub.f32 %v89_v0, %v95_v9 }
  0xc9   :  { %v562_v12 = vsub.f32 %v64_v2, %v71_v10  ;;  %v94_v13 = vpop.xlane.xlu0 %93 }
  0xca   :  { %v69_v14 = vpop.xlane.xlu1 %68  ;;  %v96_v15 = vmul.f32 0.0078125, %v94_v13  ;;  %v99_v16 = vmul.f32 %v97_v11, %v97_v11 }
  0xcb   :  { %v72_v17 = vmul.f32 0.0078125, %v69_v14  ;;  %v75_v20 = vmul.f32 %v562_v12, %v562_v12 }
  0xcc   :  { %v98_v18 = vsub.f32 %v90_v1, %v96_v15  ;;  %101 = vadd.xlane.f32.xlu0 %v99_v16 }
  0xcd   :  { %v74_v19 = vsub.f32 %v65_v3, %v72_v17 }
  0xce   :  { %v100_v21 = vmul.f32 %v98_v18, %v98_v18 }
  0xcf   :  { %v76_v22 = vmul.f32 %v74_v19, %v74_v19 }
  0xd0   :  { %103 = vadd.xlane.f32.xlu1 %v100_v21  ;;  %77 = vadd.xlane.f32.xlu0 %v75_v20 }
  0xd4   :  { %79 = vadd.xlane.f32.xlu1 %v76_v22 }
 0x159   :  { %v102_v36 = vpop.xlane.xlu0 %101 }
 0x15a   :  { %v105_v37 = vmul.f32 0.0078125, %v102_v36 }
 0x15c   :  { %v107_v38 = vadd.f32 1e-05, %v105_v37 }
 0x15d   :  { %v78_v39 = vpop.xlane.xlu0 %77  ;;  %v104_v40 = vpop.xlane.xlu1 %103 }
 0x15e   :  { %v81_v41 = vmul.f32 0.0078125, %v78_v39  ;;  %v106_v42 = vmul.f32 0.0078125, %v104_v40  ;;  %378 = vrsqrt.f32 %v107_v38 }
 0x160   :  { %v83_v43 = vadd.f32 1e-05, %v81_v41  ;;  %v108_v44 = vadd.f32 1e-05, %v106_v42 }
 0x161   :  { %v80_v45 = vpop.xlane.xlu1 %79 }
 0x162   :  { %v82_v46 = vmul.f32 0.0078125, %v80_v45  ;;  %380 = vrsqrt.f32 %v108_v44 }
 0x163   :  { %382 = vrsqrt.f32 %v83_v43 }
 0x164   :  { %v84_v47 = vadd.f32 1e-05, %v82_v46 }
 0x166   :  { %384 = vrsqrt.f32 %v84_v47 }
 0x168   :  { %v379_v48 = vpop.eup %378 }
 0x169   :  { %v111_v51 = vmul.f32 %v379_v48, %v97_v11 }
 0x16c   :  { %v381_v49 = vpop.eup %380 }
 0x16d   :  { %v383_v50 = vpop.eup %382  ;;  %v112_v52 = vmul.f32 %v381_v49, %v98_v18 }
 0x16e   :  { %v87_v55 = vmul.f32 %v383_v50, %v562_v12 }
 0x16f   :  { %v114_v54 = vpack.c.bf16 %v112_v52, %v111_v51 }
 0x170   :  { %v385_v53 = vpop.eup %384 }
 0x171   :  { %v88_v56 = vmul.f32 %v385_v53, %v74_v19  ;;  %286 = vmatprep.mubr.bf16.mxu0 %v114_v54 }
 0x173   :  { %v113_v57 = vpack.c.bf16 %v88_v56, %v87_v55 }
 0x175   :  { %287 = vmatmul.mubr.bf16.vlgmr.msra.gmra.mrb[0].mxu0 %v113_v57 }
 0x248   :  { %v348_v58 = vpop.f32.mrb[0].mxu0 }
 0x249   :  { %v349_v60 = vpop.f32.mrb[1].mxu0 }
 0x24a   :  { %v350_v61 = vadd.f32 %v349_v60, %v348_v58  ;;  %v351_v62 = vpop.f32.mrb[2].mxu0 }
 0x24b   :  { %v352_v63 = vpop.f32.mrb[3].mxu0 }
 0x24c   :  { %v289_v0 = vadd.f32 %v350_v61, %v315_v59  ;;  %v353_v1 = vadd.f32 %v352_v63, %v351_v62 }
 0x24e   :  { %295 = vst [vmem:[#allocation9] sm:$0xff] %v289_v0  ;;  %v292_v2 = vadd.f32 %v353_v1, %v315_v59 }
 0x250   :  { %296 = vst [vmem:[#allocation9 + $0x8] sm:$0xff] %v292_v2 }
 0x251   :  { %463 = shalt.err (!%p460_p0)
}
 0x252   :  { %s464_s8 = scalar_lea.hbm %s589_s4, 256 }
 0x253   :  { %p465_p1 = scmp.ne.s32.totalorder %s589_s4, %s464_s8  ;;  %p468_p2 = scmp.lt.u32.totalorder %s464_s8, %s589_s4 }
 0x255   :  { %p470_p3 = pnand %p468_p2, %p465_p1 }
 0x257   :  { %473 = shalt.err (!%p470_p3)
}
 0x258   :  { %308 = dma.vmem_to_hbm [thread:$0]  %s303_s5, 256, %s589_s4, [#allocation5], %s482_s27, %s482_s27, %s483_s28  }
 0x259   :  { %478 = dma.done.wait [#allocation5], 256  }
 0x25a   :  { %479 = vsyncadd [#allocation5], 4294967040 }
 0x25b   :  { %312 = vsyncpa [#allocation4], 1 }
 0x25c   :  { %313 = vsyncpa [#allocation7], 1 }
 0x25d   :  { %314 = vsyncpa [#allocation5], 1 }

</bundles_post_ra>
